<compile_context>
chip_gen: v5e
topology: v5e:2x2
jax: 0.10.0
libtpu: 0.0.40
codegen_flags: <defaults>
</compile_context>

<pallas_src>
import math
from functools import partial

import jax
import jax.numpy as jnp
from jax.experimental import pallas as pl
from jax.experimental.pallas import tpu as pltpu


# ------------------------------- helpers ------------------------------------

def _tile(dim, cap):
    """Largest block size <= cap that evenly divides dim (falls back to dim)."""
    if dim <= cap:
        return dim
    for t in (cap, 512, 256, 128, 64, 32, 16, 8):
        if t <= cap and dim % t == 0:
            return t
    return dim


def _layer_norm(y, g, b, eps):
    mean = jnp.mean(y, axis=-1, keepdims=True)
    var = jnp.mean((y - mean) ** 2, axis=-1, keepdims=True)
    return (y - mean) * jax.lax.rsqrt(var + eps) * g + b


def _softmax_rows(s):
    m = jnp.max(s, axis=-1, keepdims=True)
    m = jnp.maximum(m, -1e30)            # guard fully-masked rows (all -inf)
    p = jnp.exp(s - m)
    l = jnp.maximum(jnp.sum(p, axis=-1, keepdims=True), 1e-30)
    return p * pl.reciprocal(l, approx=True)   # divide on the EUP slot


# --------------------- fused linear + layernorm (+relu) ----------------------
# fc head: Linear -> LayerNorm ; embed_fc head: Linear -> LayerNorm -> ReLU.

def _linear_ln_kernel(x_ref, w_ref, b_ref, g_ref, beta_ref, o_ref, *, eps, relu):
    y = jnp.dot(x_ref[...].astype(jnp.bfloat16), w_ref[...],
                preferred_element_type=jnp.float32) + b_ref[...]
    y = _layer_norm(y, g_ref[...], beta_ref[...], eps)
    if relu:
        y = jnp.maximum(y, 0.0)
    o_ref[...] = y.astype(o_ref.dtype)


def linear_ln(x, w, b, g, beta, *, relu=False, eps=1e-5, tm=256,
              out_dtype=jnp.float32):
    M, K = x.shape
    N = w.shape[1]
    tm = _tile(M, tm)
    vec = lambda v: v.reshape(1, -1)
    return pl.pallas_call(
        partial(_linear_ln_kernel, eps=eps, relu=relu),
        grid_spec=pltpu.PrefetchScalarGridSpec(
            num_scalar_prefetch=0,
            grid=(M // tm,),
            in_specs=[
                pl.BlockSpec((tm, K), lambda i: (i, 0)),
                pl.BlockSpec((K, N), lambda i: (0, 0)),
                pl.BlockSpec((1, N), lambda i: (0, 0)),
                pl.BlockSpec((1, N), lambda i: (0, 0)),
                pl.BlockSpec((1, N), lambda i: (0, 0)),
            ],
            out_specs=pl.BlockSpec((tm, N), lambda i: (i, 0)),
        ),
        out_shape=jax.ShapeDtypeStruct((M, N), out_dtype),
        compiler_params=pltpu.CompilerParams(dimension_semantics=("parallel",)),
    )(x, w, vec(b), vec(g), vec(beta))


# ---------------------- fused QKV-proj + self-attention ----------------------
# Grid over batch; the QKV projection is done in-kernel per head by slicing
# the (E, 3E) weight ref (static slices = free views).  No qkv / probability
# tensor ever reaches HBM; ctx is stored bf16, one head slice at a time.

def _self_attn_kernel(x_ref, w_ref, b_ref, bias_ref, ctx_ref, *,
                      n_head, dh, scale):
    xb = x_ref[...].astype(jnp.bfloat16)           # (L, E)
    bias = bias_ref[...]                           # (L, L) additive mask
    E = n_head * dh
    for h in range(n_head):
        qo, ko, vo = h * dh, E + h * dh, 2 * E + h * dh
        q = (jnp.dot(xb, w_ref[:, qo:qo + dh], preferred_element_type=jnp.float32)
             + b_ref[:, qo:qo + dh]).astype(jnp.bfloat16)
        k = (jnp.dot(xb, w_ref[:, ko:ko + dh], preferred_element_type=jnp.float32)
             + b_ref[:, ko:ko + dh]).astype(jnp.bfloat16)
        v = (jnp.dot(xb, w_ref[:, vo:vo + dh], preferred_element_type=jnp.float32)
             + b_ref[:, vo:vo + dh]).astype(jnp.bfloat16)
        s = jax.lax.dot_general(q, k, (((1,), (1,)), ((), ())),
                                preferred_element_type=jnp.float32)
        p = _softmax_rows(s * scale + bias).astype(jnp.bfloat16)
        ctx_ref[:, qo:qo + dh] = jnp.dot(
            p, v, preferred_element_type=jnp.float32).astype(ctx_ref.dtype)


def self_attention(x, w_qkv, b_qkv, bias, N, L, n_head):
    E = x.shape[1]
    dh = E // n_head
    return pl.pallas_call(
        partial(_self_attn_kernel, n_head=n_head, dh=dh,
                scale=1.0 / math.sqrt(dh)),
        grid_spec=pltpu.PrefetchScalarGridSpec(
            num_scalar_prefetch=0,
            grid=(N,),
            in_specs=[
                pl.BlockSpec((L, E), lambda n: (n, 0)),
                pl.BlockSpec((E, 3 * E), lambda n: (0, 0)),
                pl.BlockSpec((1, 3 * E), lambda n: (0, 0)),
                pl.BlockSpec((None, L, L), lambda n: (n, 0, 0)),
            ],
            out_specs=pl.BlockSpec((None, L, E), lambda n: (n, 0, 0)),
        ),
        out_shape=jax.ShapeDtypeStruct((N, L, E), jnp.bfloat16),
        compiler_params=pltpu.CompilerParams(dimension_semantics=("parallel",)),
    )(x, w_qkv, b_qkv.reshape(1, -1), bias)


# ------------------- fused Q/KV-proj + cross-attention -----------------------
# Q, K, V projections are done in-kernel (q from the decoder rows, k/v from
# the bf16 encoder rows).  Outputs: bf16 ctx and the head-averaged weights.

def _cross_attn_kernel(x_ref, enc_ref, wq_ref, bq_ref, wkv_ref, bkv_ref,
                       ctx_ref, attw_ref, *, n_head, dh, scale):
    xb = x_ref[...].astype(jnp.bfloat16)           # (Lq, E)
    eb = enc_ref[...]                              # (Lk, E) bf16
    E = n_head * dh
    acc_w = jnp.zeros((xb.shape[0], eb.shape[0]), jnp.float32)
    for h in range(n_head):
        qo, vo = h * dh, E + h * dh
        q = (jnp.dot(xb, wq_ref[:, qo:qo + dh], preferred_element_type=jnp.float32)
             + bq_ref[:, qo:qo + dh]).astype(jnp.bfloat16)
        k = (jnp.dot(eb, wkv_ref[:, qo:qo + dh], preferred_element_type=jnp.float32)
             + bkv_ref[:, qo:qo + dh]).astype(jnp.bfloat16)
        v = (jnp.dot(eb, wkv_ref[:, vo:vo + dh], preferred_element_type=jnp.float32)
             + bkv_ref[:, vo:vo + dh]).astype(jnp.bfloat16)
        s = jax.lax.dot_general(q, k, (((1,), (1,)), ((), ())),
                                preferred_element_type=jnp.float32)
        p = _softmax_rows(s * scale)
        acc_w = acc_w + p
        ctx_ref[:, qo:qo + dh] = jnp.dot(
            p.astype(jnp.bfloat16), v,
            preferred_element_type=jnp.float32).astype(ctx_ref.dtype)
    attw_ref[...] = (acc_w * (1.0 / n_head)).astype(attw_ref.dtype)


def cross_attention(x, enc, wq, bq, w_kv, b_kv, N, Lq, Lk, n_head):
    E = x.shape[1]
    dh = E // n_head
    return pl.pallas_call(
        partial(_cross_attn_kernel, n_head=n_head, dh=dh,
                scale=1.0 / math.sqrt(dh)),
        grid_spec=pltpu.PrefetchScalarGridSpec(
            num_scalar_prefetch=0,
            grid=(N,),
            in_specs=[
                pl.BlockSpec((Lq, E), lambda n: (n, 0)),
                pl.BlockSpec((None, Lk, E), lambda n: (n, 0, 0)),
                pl.BlockSpec((E, E), lambda n: (0, 0)),
                pl.BlockSpec((1, E), lambda n: (0, 0)),
                pl.BlockSpec((E, 2 * E), lambda n: (0, 0)),
                pl.BlockSpec((1, 2 * E), lambda n: (0, 0)),
            ],
            out_specs=[
                pl.BlockSpec((None, Lq, E), lambda n: (n, 0, 0)),
                pl.BlockSpec((None, Lq, Lk), lambda n: (n, 0, 0)),
            ],
        ),
        out_shape=(jax.ShapeDtypeStruct((N, Lq, E), jnp.bfloat16),
                   jax.ShapeDtypeStruct((N, Lq, Lk), jnp.float32)),
        compiler_params=pltpu.CompilerParams(dimension_semantics=("parallel",)),
    )(x, enc, wq, bq.reshape(1, -1), w_kv, b_kv.reshape(1, -1))


# -------- fused out-projection + residual + layernorm + per-batch mean -------

def _proj_res_ln_mean_kernel(x_ref, w_ref, b_ref, r_ref, g_ref, beta_ref,
                             o_ref, mean_ref, *, eps):
    y = (jnp.dot(x_ref[...], w_ref[...], preferred_element_type=jnp.float32)
         + b_ref[...] + r_ref[...])
    y = _layer_norm(y, g_ref[...], beta_ref[...], eps)
    o_ref[...] = y.astype(o_ref.dtype)
    mean_ref[...] = jnp.mean(y, axis=0, keepdims=True).astype(mean_ref.dtype)


def proj_residual_ln_mean(ctx, w, b, res, g, beta, N, L, eps=1e-5):
    Ein = ctx.shape[-1]
    E = w.shape[1]
    vec = lambda v: v.reshape(1, -1)
    out, mean3 = pl.pallas_call(
        partial(_proj_res_ln_mean_kernel, eps=eps),
        grid_spec=pltpu.PrefetchScalarGridSpec(
            num_scalar_prefetch=0,
            grid=(N,),
            in_specs=[
                pl.BlockSpec((None, L, Ein), lambda n: (n, 0, 0)),
                pl.BlockSpec((Ein, E), lambda n: (0, 0)),
                pl.BlockSpec((1, E), lambda n: (0, 0)),
                pl.BlockSpec((L, E), lambda n: (n, 0)),
                pl.BlockSpec((1, E), lambda n: (0, 0)),
                pl.BlockSpec((1, E), lambda n: (0, 0)),
            ],
            out_specs=[
                pl.BlockSpec((L, E), lambda n: (n, 0)),
                pl.BlockSpec((None, 1, E), lambda n: (n, 0, 0)),
            ],
        ),
        out_shape=(jax.ShapeDtypeStruct((N * L, E), jnp.float32),
                   jax.ShapeDtypeStruct((N, 1, E), jnp.float32)),
        compiler_params=pltpu.CompilerParams(dimension_semantics=("parallel",)),
    )(ctx, w, vec(b), res, vec(g), vec(beta))
    return out, mean3.reshape(N, E)


# ----------------- fused FFN + residual + layernorm --------------------------
# The (tm, F) ReLU intermediate is produced and consumed in lane-aligned
# F-chunks so it never spills; the second matmul accumulates into (tm, E).

def _ffn_res_ln_kernel(x_ref, w1_ref, b1_ref, w2_ref, b2_ref, g_ref, beta_ref,
                       o_ref, *, eps, f_chunk):
    x = x_ref[...]
    xb = x.astype(jnp.bfloat16)
    F = w1_ref.shape[1]
    acc = jnp.zeros((x.shape[0], w2_ref.shape[1]), jnp.float32)
    for fo in range(0, F, f_chunk):
        h = (jnp.dot(xb, w1_ref[:, fo:fo + f_chunk],
                     preferred_element_type=jnp.float32)
             + b1_ref[:, fo:fo + f_chunk])
        h = jnp.maximum(h, 0.0).astype(jnp.bfloat16)
        acc = acc + jnp.dot(h, w2_ref[fo:fo + f_chunk, :],
                            preferred_element_type=jnp.float32)
    y = acc + b2_ref[...] + x
    o_ref[...] = _layer_norm(y, g_ref[...], beta_ref[...], eps).astype(o_ref.dtype)


def ffn_residual_ln(x, w1, b1, w2, b2, g, beta, eps=1e-5, tm=256):
    M, E = x.shape
    F = w1.shape[1]
    tm = _tile(M, tm)
    f_chunk = _tile(F, 512)
    return pl.pallas_call(
        partial(_ffn_res_ln_kernel, eps=eps, f_chunk=f_chunk),
        grid_spec=pltpu.PrefetchScalarGridSpec(
            num_scalar_prefetch=0,
            grid=(M // tm,),
            in_specs=[
                pl.BlockSpec((tm, E), lambda i: (i, 0)),
                pl.BlockSpec((E, F), lambda i: (0, 0)),
                pl.BlockSpec((1, F), lambda i: (0, 0)),
                pl.BlockSpec((F, E), lambda i: (0, 0)),
                pl.BlockSpec((1, E), lambda i: (0, 0)),
                pl.BlockSpec((1, E), lambda i: (0, 0)),
                pl.BlockSpec((1, E), lambda i: (0, 0)),
            ],
            out_specs=pl.BlockSpec((tm, E), lambda i: (i, 0)),
        ),
        out_shape=jax.ShapeDtypeStruct((M, E), jnp.float32),
        compiler_params=pltpu.CompilerParams(dimension_semantics=("parallel",)),
    )(x, w1, b1.reshape(1, F), w2, b2.reshape(1, E), g.reshape(1, E),
      beta.reshape(1, E))


# ---------------------------- NCE similarity loss ----------------------------
# Matches the reference exactly: logit = (logit1 + logit1.T)/2, one
# log-softmax, diagonal, mean.  diag(logit) = 2*sum(t*v) is computed directly.

def _sim_loss_kernel(t_ref, v_ref, o_ref):
    t = t_ref[...]
    v = v_ref[...]
    dims = (((1,), (1,)), ((), ()))
    logit1 = jax.lax.dot_general(t, v, dims,
                                 preferred_element_type=jnp.float32) * 2.0
    logit2 = jax.lax.dot_general(v, t, dims,
                                 preferred_element_type=jnp.float32) * 2.0
    logit = 0.5 * (logit1 + logit2)                # logit2 == logit1.T
    m = jnp.max(logit, axis=-1, keepdims=True)
    lse = jnp.log(jnp.sum(jnp.exp(logit - m), axis=-1, keepdims=True)) + m
    diag = 2.0 * jnp.sum(t * v, axis=-1, keepdims=True)   # diag of symm. logit
    o_ref[...] = jnp.mean(lse - diag).reshape(1, 1)


def sim_loss(text, visual):
    return pl.pallas_call(
        _sim_loss_kernel,
        out_shape=jax.ShapeDtypeStruct((1, 1), jnp.float32),
    )(text, visual)[0, 0]


# --------------------------------- glue --------------------------------------

def cross_transformer_layer(x, enc, bias_self, p, n_head, N, Lt, Lv):
    """x: (N*Lt, E) f32 decoder rows; enc: (N, Lv, E) bf16 encoder rows."""
    # masked self-attention (fused QKV proj) + out-proj + residual + LN + mean
    ctx = self_attention(x, p['self_att']['w_qkv'], p['self_att']['b_qkv'],
                         bias_self, N, Lt, n_head)
    out, text = proj_residual_ln_mean(ctx, p['self_att']['wo'],
                                      p['self_att']['bo'], x, p['g1'], p['b1'],
                                      N, Lt)

    # cross-attention (fused Q / KV proj) + out-proj + residual + LN + mean
    ctx, cross_w = cross_attention(out, enc, p['cross_att']['wq'],
                                   p['cross_att']['bq'], p['cross_att']['w_kv'],
                                   p['cross_att']['b_kv'], N, Lt, Lv, n_head)
    out, visual = proj_residual_ln_mean(ctx, p['cross_att']['wo'],
                                        p['cross_att']['bo'], out, p['g2'],
                                        p['b2'], N, Lt)

    # FFN (+ residual + LayerNorm) fused in one kernel
    out = ffn_residual_ln(out, p['w_ff1'], p['b_ff1'], p['w_ff2'], p['b_ff2'],
                          p['g3'], p['b3'])
    return out, cross_w, sim_loss(text, visual)


def core_forward(params, seq, dec_mask, diff_bef, diff_aft, n_head, n_layers):
    N, Lt = seq.shape
    Lv = diff_bef.shape[1]
    Dw = params['embed'].shape[1]
    H = params['fc_w'].shape[1]

    # embedding + positional encoding, then fused Linear+LayerNorm heads
    emb = params['embed'][seq]                                   # (N, Lt, Dw)
    x = emb + params['pe'][:Lt][None, :, :]
    dec = linear_ln(x.reshape(N * Lt, Dw), params['fc_w'], params['fc_b'],
                    params['fc_g'], params['fc_beta'])           # (N*Lt, H) f32

    enc_in = jnp.concatenate([diff_bef, diff_aft], axis=-1)      # (N, Lv, 2H)
    enc = linear_ln(enc_in.reshape(N * Lv, 2 * H), params['ef_w'],
                    params['ef_b'], params['ef_g'], params['ef_beta'],
                    relu=True, out_dtype=jnp.bfloat16)           # (N*Lv, H) bf16
    enc = enc.reshape(N, Lv, H)

    # additive self-attention bias: causal + key padding, shared across heads
    causal = jnp.where(jnp.tril(jnp.ones((Lt, Lt), jnp.float32)) == 1.0,
                       0.0, float('-inf'))
    key_pad = jnp.where(dec_mask > 0, 0.0, float('-inf'))        # (N, Lt)
    bias_self = causal[None, :, :] + key_pad[:, None, :]         # (N, Lt, Lt)

    cross_w, sim = None, None
    for li in range(n_layers):
        dec, cross_w, sim = cross_transformer_layer(
            dec, enc, bias_self, params['layers'][li], n_head, N, Lt, Lv)
    return dec.reshape(N, Lt, H), cross_w, sim


# ------------------------------ parameters -----------------------------------

def init_params(key, vocab, word_dim, hidden, n_head, n_layers, max_len):
    keys = iter(jax.random.split(key, 128))

    def nrm(shape, dtype=jnp.bfloat16):       # matmul weights stored bf16
        return (jax.random.normal(next(keys), shape, jnp.float32)
                * 0.02).astype(dtype)

    p = {}
    p['embed'] = nrm((vocab, word_dim), jnp.float32).at[0].set(0.0)  # pad idx 0

    pos = jnp.arange(max_len, dtype=jnp.float32)[:, None]
    div = jnp.exp(jnp.arange(0, word_dim, 2, dtype=jnp.float32)
                  * (-math.log(10000.0) / word_dim))
    pe = jnp.zeros((max_len, word_dim), jnp.float32)
    pe = pe.at[:, 0::2].set(jnp.sin(pos * div))
    pe = pe.at[:, 1::2].set(jnp.cos(pos * div))
    p['pe'] = pe

    p['fc_w'] = nrm((word_dim, hidden)); p['fc_b'] = jnp.zeros((hidden,))
    p['fc_g'] = jnp.ones((hidden,));     p['fc_beta'] = jnp.zeros((hidden,))
    p['ef_w'] = nrm((2 * hidden, hidden)); p['ef_b'] = jnp.zeros((hidden,))
    p['ef_g'] = jnp.ones((hidden,));       p['ef_beta'] = jnp.zeros((hidden,))

    def self_attn_params():
        return dict(w_qkv=nrm((hidden, 3 * hidden)),
                    b_qkv=jnp.zeros((3 * hidden,)),
                    wo=nrm((hidden, hidden)), bo=jnp.zeros((hidden,)))

    def cross_attn_params():
        return dict(wq=nrm((hidden, hidden)), bq=jnp.zeros((hidden,)),
                    w_kv=nrm((hidden, 2 * hidden)),
                    b_kv=jnp.zeros((2 * hidden,)),
                    wo=nrm((hidden, hidden)), bo=jnp.zeros((hidden,)))

    layers = []
    for _ in range(n_layers):
        layers.append(dict(
            self_att=self_attn_params(), cross_att=cross_attn_params(),
            g1=jnp.ones((hidden,)), b1=jnp.zeros((hidden,)),
            g2=jnp.ones((hidden,)), b2=jnp.zeros((hidden,)),
            g3=jnp.ones((hidden,)), b3=jnp.zeros((hidden,)),
            w_ff1=nrm((hidden, 4 * hidden)), b_ff1=jnp.zeros((4 * hidden,)),
            w_ff2=nrm((4 * hidden, hidden)), b_ff2=jnp.zeros((hidden,))))
    p['layers'] = layers
    return p


# --------------------------------- main ---------------------------------------

if __name__ == "__main__":
    vocab, word_dim, hidden = 50, 32, 32
    n_head, n_layers, max_len = 4, 2, 16
    N, Lt, Lv = 2, 8, 8

    key = jax.random.PRNGKey(0)
    kp, k1, k2, k3 = jax.random.split(key, 4)
    params = init_params(kp, vocab, word_dim, hidden, n_head, n_layers, max_len)

    dec_mask = jnp.ones((N, Lt), jnp.float32).at[1, 6:].set(0.0)   # batch 1 padded
    seq = jax.random.randint(k1, (N, Lt), 1, vocab, dtype=jnp.int32)
    seq = jnp.where(dec_mask > 0, seq, 0)
    diff_bef = jax.random.normal(k2, (N, Lv, hidden), jnp.float32)
    diff_aft = jax.random.normal(k3, (N, Lv, hidden), jnp.float32)

    out, cross_w, loss = core_forward(params, seq, dec_mask, diff_bef, diff_aft,
                                      n_head, n_layers)
    jax.block_until_ready((out, cross_w, loss))

    assert out.shape == (N, Lt, hidden)
    assert cross_w.shape == (N, Lt, Lv)
    assert loss.shape == ()
    assert bool(jnp.all(jnp.isfinite(out))) and bool(jnp.isfinite(loss))
    assert bool(jnp.all(jnp.isfinite(cross_w)))
    print("KERNEL_OK")
</pallas_src>

<mosaic_0001>
module attributes {stable_mosaic.version = 11 : i64} {
  func.func @_linear_ln_kernel(%arg0: i32, %arg1: memref<16x32xf32, #tpu.memory_space<vmem>>, %arg2: memref<32x32xbf16, #tpu.memory_space<vmem>>, %arg3: memref<1x32xf32, #tpu.memory_space<vmem>>, %arg4: memref<1x32xf32, #tpu.memory_space<vmem>>, %arg5: memref<1x32xf32, #tpu.memory_space<vmem>>, %arg6: memref<16x32xf32, #tpu.memory_space<vmem>>) attributes {dimension_semantics = [#tpu.dimension_semantics<parallel>], iteration_bounds = array<i64: 1>, scalar_prefetch = 0 : i64, scratch_operands = 0 : i64, tpu.core_type = #tpu.core_type<tc>, window_params = [{transform_indices = @transform_0, window_bounds = array<i64: 16, 32>}, {pipeline_mode = #tpu.pipeline_mode<synchronous>, transform_indices = @transform_1, window_bounds = array<i64: 32, 32>}, {pipeline_mode = #tpu.pipeline_mode<synchronous>, transform_indices = @transform_2, window_bounds = array<i64: 1, 32>}, {pipeline_mode = #tpu.pipeline_mode<synchronous>, transform_indices = @transform_3, window_bounds = array<i64: 1, 32>}, {pipeline_mode = #tpu.pipeline_mode<synchronous>, transform_indices = @transform_4, window_bounds = array<i64: 1, 32>}, {transform_indices = @transform_5, window_bounds = array<i64: 16, 32>}]} {
    %c0 = arith.constant 0 : index
    %c0_0 = arith.constant 0 : index
    %0 = vector.load %arg1[%c0, %c0_0] : memref<16x32xf32, #tpu.memory_space<vmem>>, vector<16x32xf32>
    %1 = arith.truncf %0 : vector<16x32xf32> to vector<16x32xbf16>
    %c0_1 = arith.constant 0 : index
    %c0_2 = arith.constant 0 : index
    %2 = vector.load %arg2[%c0_1, %c0_2] : memref<32x32xbf16, #tpu.memory_space<vmem>>, vector<32x32xbf16>
    %cst = arith.constant dense<0.000000e+00> : vector<16x32xf32>
    %3 = tpu.matmul %1, %2, %cst {dimension_numbers = #tpu.dot_dimension_numbers<[1], [0], [0], [1], [0, 0, 1, 1], [], []>} : vector<16x32xbf16>, vector<32x32xbf16>, vector<16x32xf32> -> vector<16x32xf32>
    %c0_3 = arith.constant 0 : index
    %c0_4 = arith.constant 0 : index
    %4 = vector.load %arg3[%c0_3, %c0_4] : memref<1x32xf32, #tpu.memory_space<vmem>>, vector<1x32xf32>
    %5 = vector.broadcast %4 : vector<1x32xf32> to vector<16x32xf32>
    %6 = arith.addf %3, %5 : vector<16x32xf32>
    %c0_5 = arith.constant 0 : index
    %c0_6 = arith.constant 0 : index
    %7 = vector.load %arg4[%c0_5, %c0_6] : memref<1x32xf32, #tpu.memory_space<vmem>>, vector<1x32xf32>
    %c0_7 = arith.constant 0 : index
    %c0_8 = arith.constant 0 : index
    %8 = vector.load %arg5[%c0_7, %c0_8] : memref<1x32xf32, #tpu.memory_space<vmem>>, vector<1x32xf32>
    %cst_9 = arith.constant dense<0.000000e+00> : vector<16xf32>
    %9 = vector.multi_reduction <add>, %6, %cst_9 [1] : vector<16x32xf32> to vector<16xf32>
    %10 = vector.shape_cast %9 : vector<16xf32> to vector<16x1xf32>
    %cst_10 = arith.constant 3.200000e+01 : f32
    %11 = vector.broadcast %cst_10 : f32 to vector<16x1xf32>
    %12 = arith.divf %10, %11 : vector<16x1xf32>
    %13 = vector.broadcast %12 : vector<16x1xf32> to vector<16x32xf32>
    %14 = arith.subf %6, %13 : vector<16x32xf32>
    %15 = arith.mulf %14, %14 : vector<16x32xf32>
    %cst_11 = arith.constant dense<0.000000e+00> : vector<16xf32>
    %16 = vector.multi_reduction <add>, %15, %cst_11 [1] : vector<16x32xf32> to vector<16xf32>
    %17 = vector.shape_cast %16 : vector<16xf32> to vector<16x1xf32>
    %cst_12 = arith.constant 3.200000e+01 : f32
    %18 = vector.broadcast %cst_12 : f32 to vector<16x1xf32>
    %19 = arith.divf %17, %18 : vector<16x1xf32>
    %20 = vector.broadcast %12 : vector<16x1xf32> to vector<16x32xf32>
    %21 = arith.subf %6, %20 : vector<16x32xf32>
    %cst_13 = arith.constant 9.99999974E-6 : f32
    %22 = vector.broadcast %cst_13 : f32 to vector<16x1xf32>
    %23 = arith.addf %19, %22 : vector<16x1xf32>
    %24 = math.rsqrt %23 : vector<16x1xf32>
    %25 = vector.broadcast %24 : vector<16x1xf32> to vector<16x32xf32>
    %26 = arith.mulf %21, %25 : vector<16x32xf32>
    %27 = vector.broadcast %7 : vector<1x32xf32> to vector<16x32xf32>
    %28 = arith.mulf %26, %27 : vector<16x32xf32>
    %29 = vector.broadcast %8 : vector<1x32xf32> to vector<16x32xf32>
    %30 = arith.addf %28, %29 : vector<16x32xf32>
    %c0_14 = arith.constant 0 : index
    %c0_15 = arith.constant 0 : index
    %31 = vector.load %arg6[%c0_14, %c0_15] : memref<16x32xf32, #tpu.memory_space<vmem>>, vector<16x32xf32>
    tpu.vector_store %arg6[%c0_14, %c0_15], %30 {strides = array<i32>} : memref<16x32xf32, #tpu.memory_space<vmem>>, vector<16x32xf32>,
    return
  }
  func.func @transform_0(%arg0: i32) -> (i32, i32) {
    %c0_i32 = arith.constant 0 : i32
    %c0_i32_0 = arith.constant 0 : i32
    return %arg0, %c0_i32 : i32, i32
  }
  func.func @transform_1(%arg0: i32) -> (i32, i32) {
    %c0_i32 = arith.constant 0 : i32
    %c0_i32_0 = arith.constant 0 : i32
    %c0_i32_1 = arith.constant 0 : i32
    return %c0_i32, %c0_i32_0 : i32, i32
  }
  func.func @transform_2(%arg0: i32) -> (i32, i32) {
    %c0_i32 = arith.constant 0 : i32
    %c0_i32_0 = arith.constant 0 : i32
    %c0_i32_1 = arith.constant 0 : i32
    return %c0_i32, %c0_i32_0 : i32, i32
  }
  func.func @transform_3(%arg0: i32) -> (i32, i32) {
    %c0_i32 = arith.constant 0 : i32
    %c0_i32_0 = arith.constant 0 : i32
    %c0_i32_1 = arith.constant 0 : i32
    return %c0_i32, %c0_i32_0 : i32, i32
  }
  func.func @transform_4(%arg0: i32) -> (i32, i32) {
    %c0_i32 = arith.constant 0 : i32
    %c0_i32_0 = arith.constant 0 : i32
    %c0_i32_1 = arith.constant 0 : i32
    return %c0_i32, %c0_i32_0 : i32, i32
  }
  func.func @transform_5(%arg0: i32) -> (i32, i32) {
    %c0_i32 = arith.constant 0 : i32
    %c0_i32_0 = arith.constant 0 : i32
    return %arg0, %c0_i32 : i32, i32
  }
}

</mosaic_0001>

<bundles_post_ra>
// kernel: tpu_custom_call.1
= control target key start
LH: loop header
LB: loop body
LE: loop exit
PB: predicated region body
PF: predicated region fallthrough
CT: control target
= control target key end

     0   :  { %10 = vsyncpa [#allocation3], 0  ;;  %s355_s0 = inlined_call_operand.hbm [shape: f32[16,32], index: 0, kind: input, shape index: {}]   ;;  %s356_s1 = inlined_call_operand.hbm [shape: bf16[32,32], index: 1, kind: input, shape index: {}]   ;;  %s357_s2 = inlined_call_operand.vmem [shape: f32[1,32], index: 2, kind: input, shape index: {}]   ;;  %s358_s3 = inlined_call_operand.vmem [shape: f32[1,32], index: 3, kind: input, shape index: {}]   ;;  %s359_s4 = inlined_call_operand.vmem [shape: f32[1,32], index: 4, kind: input, shape index: {}]   ;;  %s360_s5 = inlined_call_operand.hbm [shape: f32[16,32], index: 5, kind: output, shape index: {}]  }
   0x1   :  { %11 = vsyncpa [#allocation6], 0 }
   0x2   :  { %12 = vsyncpa [#allocation4], 0  ;;  %s17_s20 = sshll.u32 %s355_s0, 4  ;;  %s286_s21 = smov [#allocation2]   ;;  %s18_s20 = int_to_ptr.hbm [resolvable:$true] %s17_s20 }
   0x3   :  { %s19_s22 = sshll.u32 %s286_s21, 4  ;;  %s30_s25 = sshll.u32 %s356_s1, 4  ;;  %s20_s22 = int_to_ptr.vmem [resolvable:$true] %s19_s22  ;;  %s31_s25 = int_to_ptr.hbm [resolvable:$true] %s30_s25 }
   0x4   :  { %s287_s26 = smov 128   ;;  %s288_s27 = smov 8  }
   0x5   :  { %25 = dma.hbm_to_vmem [thread:$0]  %s18_s20, 256, %s20_s22, [#allocation3], %s287_s26, %s287_s26, %s288_s27  }
   0x6   :  { %s289_s28 = smov [#allocation5]   ;;  %s290_s30 = smov 64  }
   0x7   :  { %s32_s29 = sshll.u32 %s289_s28, 4  ;;  %s291_s0 = smov 4   ;;  %s33_s29 = int_to_ptr.vmem [resolvable:$true] %s32_s29 }
   0x8   :  { %38 = dma.hbm_to_vmem [thread:$0]  %s31_s25, 256, %s33_s29, [#allocation6], %s290_s30, %s290_s30, %s291_s0  }
   0x9   :  { %280 = dma.done.wait [#allocation3], 256  }
   0xa   :  { %281 = vsyncadd [#allocation3], 4294967040 }
   0xb   :  { %282 = dma.done.wait [#allocation6], 256  }
   0xc   :  { %283 = vsyncadd [#allocation6], 4294967040  ;;  %v190_v0 = vld [vmem:[#allocation5 + $0x8] sm:$0xff]  ;;  %v189_v1 = vld [vmem:[#allocation5] sm:$0xff]  ;;  %vm77_vm0 = vcmask 261120   ;;  %v292_v12 = vmov 32.0  }
   0xd   :  { %v54_v2 = vld [vmem:[#allocation2] sm:$0xff]  ;;  %87 = vmatpush.bf16.msra.mxu0 %v190_v0  ;;  %v55_v3 = vld [vmem:[#allocation2 + $0x8] sm:$0xff]  ;;  %202 = vrcp.f32 %v292_v12  ;;  %s166_s13 = sshll.u32 %s360_s5, 4  ;;  %s167_s13 = int_to_ptr.hbm [resolvable:$true] %s166_s13 }
   0xe   :  { %v56_v4 = vpack.c.bf16 %v55_v3, %v54_v2  ;;  %v199_v5 = vld [vmem:[%s357_s2] ss:$0 sm:$0xff] }
   0xf   :  { %v200_v43 = vld [vmem:[%s358_s3] ss:$0 sm:$0xff]  ;;  %s293_s3 = smov [#allocation7]  }
  0x10   :  { %v201_v47 = vld [vmem:[%s359_s4] ss:$0 sm:$0xff]  ;;  %s164_s10 = sshll.u32 %s293_s3, 4  ;;  %s165_s10 = int_to_ptr.vmem [resolvable:$true] %s164_s10 }
  0x11   :  { %88 = vmatpush.bf16.msra.mxu0 %v189_v1 }
  0x13   :  { %v203_v13 = vpop.eup %202 }
  0x14   :  { %188 = vmatmul.msk.bf16.vlgmr.msra.gmra.mxu0 %vm77_vm0, %v56_v4  ;;  %v104_v14 = vmul.f32 32.0, %v203_v13  ;;  %vm108_vm1 = vweird.f32 %v203_v13 }
  0x16   :  { %v105_v15 = vsub.f32 1.0, %v104_v14 }
  0x18   :  { %v106_v16 = vmul.f32 %v203_v13, %v105_v15 }
  0x1a   :  { %v107_v17 = vadd.f32 %v203_v13, %v106_v16 }
  0x1c   :  { %v109_v18 = vsel %vm108_vm1, %v203_v13, %v107_v17 }
  0x91   :  { %v90_v6 = vpop.f32.mrf.mxu0 }
  0x92   :  { %v91_v7 = vadd.f32 %v199_v5, %v90_v6 }
  0x94   :  { %v97_v8 = vsel %vm77_vm0, %v91_v7, 0.0 }
  0x95   :  { %98 = vadd.xlane.f32.xlu0 %v97_v8 }
  0x99   :  { %v92_v9 = vpop.f32.mrf.mxu0 }
  0x9a   :  { %v93_v10 = vadd.f32 %v199_v5, %v92_v9 }
  0x9c   :  { %v100_v11 = vsel %vm77_vm0, %v93_v10, 0.0 }
  0x9d   :  { %101 = vadd.xlane.f32.xlu0 %v100_v11 }
 0x108   :  { %v99_v19 = vpop.xlane.xlu0 %98 }
 0x109   :  { %v110_v20 = vmul.f32 %v109_v18, %v99_v19 }
 0x10b   :  { %v112_v21 = vsub.f32 %v91_v7, %v110_v20 }
 0x10d   :  { %v114_v22 = vmul.f32 %v112_v21, %v112_v21 }
 0x10f   :  { %v116_v23 = vsel %vm77_vm0, %v114_v22, 0.0 }
 0x110   :  { %117 = vadd.xlane.f32.xlu1 %v116_v23  ;;  %v102_v24 = vpop.xlane.xlu0 %101 }
 0x111   :  { %v111_v25 = vmul.f32 %v109_v18, %v102_v24 }
 0x113   :  { %v113_v26 = vsub.f32 %v93_v10, %v111_v25 }
 0x115   :  { %v115_v27 = vmul.f32 %v113_v26, %v113_v26 }
 0x117   :  { %v119_v28 = vsel %vm77_vm0, %v115_v27, 0.0 }
 0x118   :  { %120 = vadd.xlane.f32.xlu1 %v119_v28 }
 0x183   :  { %v118_v29 = vpop.xlane.xlu1 %117 }
 0x184   :  { %v122_v30 = vmul.f32 %v118_v29, %v109_v18 }
 0x186   :  { %v124_v31 = vadd.f32 1e-05, %v122_v30 }
 0x188   :  { %204 = vrsqrt.f32 %v124_v31  ;;  %vm132_vm3 = vweird.f32 %v124_v31 }
 0x18b   :  { %v121_v32 = vpop.xlane.xlu1 %120 }
 0x18c   :  { %v123_v33 = vmul.f32 %v121_v32, %v109_v18 }
 0x18e   :  { %v205_v34 = vpop.eup %204  ;;  %v125_v35 = vadd.f32 1e-05, %v123_v33 }
 0x18f   :  { %v127_v36 = vmul.f32 %v205_v34, %v124_v31  ;;  %vm133_vm2 = vweird.f32 %v205_v34 }
 0x190   :  { %206 = vrsqrt.f32 %v125_v35  ;;  %vm134_vm4 = vmor %vm132_vm3, %vm133_vm2  ;;  %vm142_vm6 = vweird.f32 %v125_v35 }
 0x191   :  { %v128_v37 = vmul.f32 %v205_v34, %v127_v36 }
 0x193   :  { %v129_v38 = vmul.f32 0.5, %v128_v37 }
 0x195   :  { %v130_v39 = vsub.f32 1.5, %v129_v38 }
 0x196   :  { %v207_v40 = vpop.eup %206 }
 0x197   :  { %v131_v41 = vmul.f32 %v205_v34, %v130_v39  ;;  %v137_v42 = vmul.f32 %v207_v40, %v125_v35  ;;  %vm143_vm5 = vweird.f32 %v207_v40 }
 0x198   :  { %vm144_vm7 = vmor %vm142_vm6, %vm143_vm5 }
 0x199   :  { %v135_v44 = vsel %vm134_vm4, %v205_v34, %v131_v41  ;;  %v138_v45 = vmul.f32 %v207_v40, %v137_v42 }
 0x19a   :  { %v146_v46 = vmul.f32 %v135_v44, %v112_v21 }
 0x19b   :  { %v139_v48 = vmul.f32 0.5, %v138_v45 }
 0x19c   :  { %v151_v49 = vmul.f32 %v200_v43, %v146_v46 }
 0x19d   :  { %v140_v50 = vsub.f32 1.5, %v139_v48 }
 0x19e   :  { %v156_v51 = vadd.f32 %v201_v47, %v151_v49 }
 0x19f   :  { %v141_v52 = vmul.f32 %v207_v40, %v140_v50 }
 0x1a0   :  { %158 = vst.msk [vmem:[#allocation7] sm:$0xff] %vm77_vm0, %v156_v51 }
 0x1a1   :  { %v145_v53 = vsel %vm144_vm7, %v207_v40, %v141_v52 }
 0x1a2   :  { %v147_v54 = vmul.f32 %v145_v53, %v113_v26 }
 0x1a4   :  { %v152_v55 = vmul.f32 %v200_v43, %v147_v54 }
 0x1a6   :  { %v157_v56 = vadd.f32 %v201_v47, %v152_v55 }
 0x1a8   :  { %159 = vst.msk [vmem:[#allocation7 + $0x8] sm:$0xff] %vm77_vm0, %v157_v56 }
 0x1a9   :  { %172 = dma.vmem_to_hbm [thread:$0]  %s165_s10, 256, %s167_s13, [#allocation4], %s287_s26, %s287_s26, %s288_s27  }
 0x1aa   :  { %284 = dma.done.wait [#allocation4], 256  }
 0x1ab   :  { %285 = vsyncadd [#allocation4], 4294967040 }
 0x1ac   :  { %177 = vsyncpa [#allocation3], 1 }
 0x1ad   :  { %178 = vsyncpa [#allocation6], 1 }
 0x1ae   :  { %179 = vsyncpa [#allocation4], 1 }

</bundles_post_ra>
